<compile_context>
chip_gen: v7x
topology: tpu7x:2x2x1
jax: 0.10.0
libtpu: 0.0.40
codegen_flags: <defaults>
</compile_context>

<pallas_src>
import functools

import jax
import jax.numpy as jnp
from jax.experimental import pallas as pl
from jax.experimental.pallas import tpu as pltpu


def _round_up(x, m):
    return ((x + m - 1) // m) * m


def _bf16_eup_ok():
    """bf16 VPU/EUP exists on v6e and newer; keep the f32 path on <= v5e."""
    try:
        kind = jax.devices()[0].device_kind.lower()
    except Exception:
        return False
    return not any(v in kind for v in ("v2", "v3", "v4", "v5"))


# ---------------------------------------------------------------------------
# Kernel: lane-dense softplus sum over one (tile_m, 128) block of the packed,
# sign-flipped slab.
#   xd_ref : (tile_m, 128) pred-dtype block
#   out_ref: (1, 1, 128) f32 per-split accumulator row (resident across the
#            inner "arbitrary" axis; distinct row per "parallel" split).
# Cross-lane collapse + divide by num_classes are deferred to the wrapper.
# ---------------------------------------------------------------------------
def _softplus_sum_kernel(xd_ref, out_ref, *, bf16_compute):
    i = pl.program_id(1)

    @pl.when(i == 0)
    def _():
        out_ref[...] = jnp.zeros_like(out_ref)

    x = xd_ref[...]
    if not bf16_compute:
        x = x.astype(jnp.float32)          # promote in-register (f32 EUP path)
    sp = jnp.maximum(x, 0) + jnp.log1p(jnp.exp(-jnp.abs(x)))
    # Sublane reduce per step, f32 accumulation; lanes collapse in the wrapper.
    out_ref[...] += jnp.sum(sp.astype(jnp.float32), axis=0, keepdims=True)[None]


def bce_loss(pred, targ, num_classes, *, tile_m=8192, n_split=2, bf16_eup=None):
    """Pallas equivalent of BCE_Loss(num_classes).forward(pred, targ)."""
    n, cp1 = pred.shape
    assert cp1 == num_classes + 1, "pred must have num_classes+1 columns"
    dtype = pred.dtype
    if bf16_eup is None:
        bf16_eup = _bf16_eup_ok()
    bf16_compute = (dtype == jnp.bfloat16) and bf16_eup

    # ---- single XLA pass over pred: slice foreground columns, flip the sign of
    # the target column (folds the one-hot term exactly), flatten + pad to a
    # lane-dense (m_pad, 128) slab.  Background targets (== num_classes) match
    # no foreground column, so they are left unflipped -> t == 0 everywhere.
    x_fg = pred[:, :num_classes]
    cls_ids = jax.lax.broadcasted_iota(jnp.int32, (n, num_classes), 1)
    is_target = cls_ids == targ.astype(jnp.int32)[:, None]
    flat = jnp.where(is_target, -x_fg, x_fg).reshape(-1)      # stays in pred dtype

    l = flat.shape[0]
    rows = pl.cdiv(l, 128)
    tile_m = _round_up(min(tile_m, _round_up(rows, 8)), 8)
    rows_per_split = _round_up(pl.cdiv(rows, n_split), tile_m)
    steps = rows_per_split // tile_m
    m_pad = rows_per_split * n_split
    pad = m_pad * 128 - l
    # sp(-1e30) == 0 exactly (f32 and bf16), so padding is inert: no tail mask.
    dense = jnp.concatenate(
        [flat, jnp.full((pad,), -1e30, dtype=dtype)]).reshape(m_pad, 128)

    kernel = functools.partial(_softplus_sum_kernel, bf16_compute=bf16_compute)
    partials = pl.pallas_call(
        kernel,
        out_shape=jax.ShapeDtypeStruct((n_split, 1, 128), jnp.float32),
        grid_spec=pltpu.PrefetchScalarGridSpec(
            num_scalar_prefetch=0,
            grid=(n_split, steps),
            in_specs=[pl.BlockSpec((tile_m, 128),
                                   lambda s, i: (s * steps + i, 0))],
            out_specs=pl.BlockSpec((1, 1, 128), lambda s, i: (s, 0, 0)),
        ),
        compiler_params=pltpu.CompilerParams(
            dimension_semantics=("parallel", "arbitrary")),
    )(dense)

    # Final cross-lane / cross-core reduce + normalization, outside the hot loop.
    return jnp.sum(partials) / jnp.float32(num_classes)


def _reference_bce_loss(pred, targ, num_classes):
    """Pure-JAX reference mirroring the PyTorch module."""
    t = jax.nn.one_hot(targ, num_classes + 1, dtype=jnp.float32)[:, :-1]
    x = pred[:, :-1].astype(jnp.float32)
    elem = jnp.maximum(x, 0.0) - x * t + jnp.log1p(jnp.exp(-jnp.abs(x)))
    return jnp.sum(elem) / num_classes


if __name__ == "__main__":
    num_classes = 8
    key = jax.random.PRNGKey(0)
    k1, k2, k3, k4 = jax.random.split(key, 4)

    # Case 1: small, tile-aligned, f32 logits.
    n1 = 16
    pred1 = jax.random.normal(k1, (n1, num_classes + 1), dtype=jnp.float32)
    targ1 = jax.random.randint(k2, (n1,), 0, num_classes + 1, dtype=jnp.int32)
    loss1 = jax.block_until_ready(bce_loss(pred1, targ1, num_classes))
    ref1 = _reference_bce_loss(pred1, targ1, num_classes)
    assert jnp.allclose(loss1, ref1, rtol=1e-5, atol=1e-5), (loss1, ref1)

    # Case 2: N not aligned to the tile -> multi-step, multi-split grid + padding.
    n2 = 261
    pred2 = jax.random.normal(k3, (n2, num_classes + 1), dtype=jnp.float32)
    targ2 = jax.random.randint(k4, (n2,), 0, num_classes + 1, dtype=jnp.int32)
    loss2 = jax.block_until_ready(bce_loss(pred2, targ2, num_classes, tile_m=8))
    ref2 = _reference_bce_loss(pred2, targ2, num_classes)
    assert jnp.allclose(loss2, ref2, rtol=1e-4, atol=1e-4), (loss2, ref2)

    # Case 3: bf16 logits stay bf16 on the HBM wire; bf16 EUP path auto-enabled
    # on v6e/v7x, f32-promote path on v5e and older.
    pred3 = pred1.astype(jnp.bfloat16)
    loss3 = jax.block_until_ready(bce_loss(pred3, targ1, num_classes))
    ref3 = _reference_bce_loss(pred3, targ1, num_classes)
    assert jnp.allclose(loss3, ref3, rtol=1e-2, atol=1e-2), (loss3, ref3)

    # Case 4: bf16 input with the f32-promote path forced, so both kernel
    # branches are exercised regardless of which chip this runs on.
    loss4 = jax.block_until_ready(
        bce_loss(pred3, targ1, num_classes, bf16_eup=False))
    assert jnp.allclose(loss4, ref3, rtol=1e-2, atol=1e-2), (loss4, ref3)

    print("KERNEL_OK")
</pallas_src>

<mosaic_0001>
module attributes {stable_mosaic.version = 11 : i64} {
  func.func @_softplus_sum_kernel(%arg0: i32, %arg1: i32, %arg2: memref<8x128xf32, #tpu.memory_space<vmem>>, %arg3: memref<1x1x128xf32, #tpu.memory_space<vmem>>) attributes {dimension_semantics = [#tpu.dimension_semantics<parallel>, #tpu.dimension_semantics<arbitrary>], iteration_bounds = array<i64: 2, 1>, scalar_prefetch = 0 : i64, scratch_operands = 0 : i64, tpu.core_type = #tpu.core_type<tc>, window_params = [{transform_indices = @transform_0, window_bounds = array<i64: 8, 128>}, {transform_indices = @transform_1, window_bounds = array<i64: 1, 1, 128>}]} {
    %c0_i32 = arith.constant 0 : i32
    %0 = arith.cmpi eq, %arg1, %c0_i32 : i32
    %1 = arith.extui %0 : i1 to i32
    %c0_i32_0 = arith.constant 0 : i32
    %2 = arith.cmpi ne, %1, %c0_i32_0 : i32
    scf.if %2 {
      %cst_10 = arith.constant 0.000000e+00 : f32
      %18 = vector.broadcast %cst_10 : f32 to vector<1x1x128xf32>
      %c0_11 = arith.constant 0 : index
      %c0_12 = arith.constant 0 : index
      %c0_13 = arith.constant 0 : index
      %19 = vector.load %arg3[%c0_11, %c0_12, %c0_13] : memref<1x1x128xf32, #tpu.memory_space<vmem>>, vector<1x1x128xf32>
      tpu.vector_store %arg3[%c0_11, %c0_12, %c0_13], %18 {strides = array<i32>} : memref<1x1x128xf32, #tpu.memory_space<vmem>>, vector<1x1x128xf32>,
    } else {
    }
    %c0 = arith.constant 0 : index
    %c0_1 = arith.constant 0 : index
    %3 = vector.load %arg2[%c0, %c0_1] : memref<8x128xf32, #tpu.memory_space<vmem>>, vector<8x128xf32>
    %cst = arith.constant 0.000000e+00 : f32
    %4 = vector.broadcast %cst : f32 to vector<8x128xf32>
    %5 = arith.maximumf %3, %4 : vector<8x128xf32>
    %6 = math.absf %3 : vector<8x128xf32>
    %cst_2 = arith.constant 0.000000e+00 : f32
    %7 = vector.broadcast %cst_2 : f32 to vector<8x128xf32>
    %8 = arith.subf %7, %6 : vector<8x128xf32>
    %9 = math.exp %8 : vector<8x128xf32>
    %10 = math.log1p %9 : vector<8x128xf32>
    %11 = arith.addf %5, %10 : vector<8x128xf32>
    %c0_3 = arith.constant 0 : index
    %c0_4 = arith.constant 0 : index
    %c0_5 = arith.constant 0 : index
    %12 = vector.load %arg3[%c0_3, %c0_4, %c0_5] : memref<1x1x128xf32, #tpu.memory_space<vmem>>, vector<1x1x128xf32>
    %cst_6 = arith.constant dense<0.000000e+00> : vector<128xf32>
    %13 = vector.multi_reduction <add>, %11, %cst_6 [0] : vector<8x128xf32> to vector<128xf32>
    %14 = vector.shape_cast %13 : vector<128xf32> to vector<1x128xf32>
    %15 = vector.shape_cast %14 : vector<1x128xf32> to vector<1x1x128xf32>
    %16 = arith.addf %12, %15 : vector<1x1x128xf32>
    %c0_7 = arith.constant 0 : index
    %c0_8 = arith.constant 0 : index
    %c0_9 = arith.constant 0 : index
    %17 = vector.load %arg3[%c0_7, %c0_8, %c0_9] : memref<1x1x128xf32, #tpu.memory_space<vmem>>, vector<1x1x128xf32>
    tpu.vector_store %arg3[%c0_7, %c0_8, %c0_9], %16 {strides = array<i32>} : memref<1x1x128xf32, #tpu.memory_space<vmem>>, vector<1x1x128xf32>,
    return
  }
  func.func @transform_0(%arg0: i32, %arg1: i32) -> (i32, i32) {
    %c1_i32 = arith.constant 1 : i32
    %0 = arith.muli %arg0, %c1_i32 : i32
    %1 = arith.addi %0, %arg1 : i32
    %c0_i32 = arith.constant 0 : i32
    %c0_i32_0 = arith.constant 0 : i32
    return %1, %c0_i32 : i32, i32
  }
  func.func @transform_1(%arg0: i32, %arg1: i32) -> (i32, i32, i32) {
    %c0_i32 = arith.constant 0 : i32
    %c0_i32_0 = arith.constant 0 : i32
    %c0_i32_1 = arith.constant 0 : i32
    return %arg0, %c0_i32, %c0_i32_0 : i32, i32, i32
  }
}

</mosaic_0001>

<bundles_post_ra>
// kernel: tpu_custom_call.1
= control target key start
LH: loop header
LB: loop body
LE: loop exit
PB: predicated region body
PF: predicated region fallthrough
CT: control target
= control target key end

     0   :  { %6 = vsyncpa [#allocation3], 0  ;;  %s649_s0 = inlined_call_operand.hbm [shape: f32[16,128], index: 0, kind: input, shape index: {}]   ;;  %s650_s1 = inlined_call_operand.hbm [shape: f32[2,1,128], index: 1, kind: output, shape index: {}]  }
   0x1   :  { %8 = vsyncpa [#allocation3 + $0x1], 0 }
   0x2   :  { %9 = vsyncpa [#allocation4], 0 }
   0x3   :  { %11 = vsyncpa [#allocation4 + $0x1], 0  ;;  %s470_s6 = smov 0   ;;  %s472_s7 = smov 0  }
   0x4   :  { %s474_s8 = smov 0   ;;  %s476_s9 = smov 0  }
   0x5   :  { %s478_s10 = smov 0   ;;  %s480_s11 = smov 0  }
   0x6 LB: > { %s265_s12 = sadd.s32 4294967295, %s455_s11   ;;  %s266_s13 = sadd.s32 4294967294, %s455_s11   ;;  %s455_s11 = sphi %s480_s11, %s17_s11   ;;  %s451_s10 = sphi %s478_s10, %s666_s10   ;;  %s447_s9 = sphi %s476_s9, %s665_s9   ;;  %s443_s8 = sphi %s474_s8, %s664_s8   ;;  %s439_s7 = sphi %s472_s7, %s663_s7   ;;  %s435_s6 = sphi %s470_s6, %s662_s6  }
   0x7   : > { %s29_s14 = sadd.s32 1, %s451_s10  ;;  %s38_s15 = sadd.s32 1, %s443_s8 }
   0x8   : > { %p31_p0 = scmp.ge.s32.totalorder %s29_s14, 2  ;;  %p45_p1 = scmp.ne.s32.totalorder %s443_s8, %s439_s7 }
   0x9   : > { %p46_p2 = scmp.eq.s32.totalorder %s455_s11, 0  ;;  %p51_p3 = scmp.ne.s32.totalorder %s439_s7, %s435_s6 }
   0xa   : > { %s668_s14 = smov (%p31_p0, %s29_s14), 0  ;;  %p52_p5 = scmp.eq.s32.totalorder %s265_s12, 0 }
   0xb   : > { %p511_p4 = por %p46_p2, %p45_p1  ;;  %s35_s17 = ssub.s32 %s451_s10, %s668_s14 }
   0xc   : > { %p75_p6 = scmp.eq.s32.totalorder %s265_s12, 1  ;;  %p36_p7 = scmp.eq.s32.totalorder %s35_s17, 0 }
   0xd   : > { %p517_p8 = por %p52_p5, %p51_p3  ;;  %p81_p10 = scmp.eq.s32.totalorder %s266_s13, 1 }
   0xe   : > { %p521_p9 = por %p75_p6, %p45_p1  ;;  %p288_p13 = scmp.lt.s32.totalorder %s455_s11, 2 }
   0xf   : > { %s526_s20 = scalar_select %p36_p7, %s443_s8, %s38_s15  }
  0x10   : > { %s654_s19 = scalar_select %p521_p9, 1, 0 }
  0x11   : > { %p528_p11 = por %p81_p10, %p51_p3  ;;  %s101_s22 = sand.u32 1, %s443_s8  }
  0x12   : > { %s269_s23 = sshll.u32 %s101_s22, 3  ;;  %s270_s24 = sshll.u32 %s451_s10, 7 }
  0x13   : > { %s655_s21 = scalar_select %p528_p11, 1, 0 }
  0x14   : > { %s539_s27 = scalar_lea.hbm %s649_s0, %s270_s24  ;;  %s105_s28 = scalar_lea.vmem [#allocation2], %s269_s23 }
  0x15   : > { %s113_s29 = sshll.u32 %s105_s28, 4  ;;  %p545_p0 = pnand %p288_p13, %p511_p4  ;;  %s541_s29 = int_to_ptr.vmem [resolvable:$true] %s113_s29 }
  0x16   : > { %s102_s2 = scalar_lea.sflag [#allocation3], %s101_s22  ;;  %s343_s3 = scalar_lea.hbm %s539_s27, 128 }
  0x17   : > { %p344_p3 = scmp.ne.s32.totalorder %s539_s27, %s343_s3  ;;  %p345_p5 = pneg %p545_p0 }
  0x18   : > { %s348_s12 = scalar_lea.hbm %s649_s0, 256  ;;  %p349_p4 = scmp.lt.u32.totalorder %s539_s27, %s649_s0 }
  0x19   : > { %p346_p6 = pnand %p345_p5, %p344_p3  ;;  %p350_p10 = scmp.lt.u32.totalorder %s348_s12, %s343_s3 }
  0x1a   : > { %p352_p12 = scmp.lt.u32.totalorder %s343_s3, %s539_s27 }
  0x1b   : > { %p347_p7 = pneg %p346_p6  ;;  %p351_p13 = por %p350_p10, %p349_p4 }
  0x1d   : > { %p353_p1 = por %p352_p12, %p351_p13 }
  0x1f   : > { %p354_p2 = pnand %p353_p1, %p347_p7 }
  0x21   : > { %357 = shalt.err (!%p354_p2)
}
  0x22   : > { %s358_s16 = scalar_lea.vmem %s541_s29, 128  ;;  %s457_s17 = smov [#allocation2]  }
  0x23   : > { %p359_p3 = scmp.ne.s32.totalorder %s541_s29, %s358_s16  ;;  %s363_s22 = sshll.u32 %s457_s17, 4  ;;  %s364_s22 = int_to_ptr.vmem [resolvable:$false] %s363_s22 }
  0x24   : > { %s365_s23 = scalar_lea.vmem %s364_s22, 256  ;;  %p366_p9 = scmp.lt.s32.totalorder %s541_s29, %s364_s22 }
  0x25   : > { %p361_p6 = pnand %p359_p3, %p345_p5  ;;  %p367_p4 = scmp.lt.s32.totalorder %s365_s23, %s358_s16 }
  0x27   : > { %p362_p11 = pneg %p361_p6  ;;  %p368_p10 = por %p367_p4, %p366_p9 }
  0x29   : > { %p369_p12 = pnand %p368_p10, %p362_p11 }
  0x2b   : > { %372 = shalt.err (!%p369_p12)
}
  0x2c   : > { %283 = dma.hbm_to_vmem [thread:$0]  (!%p545_p0), %s539_s27, 128, %s541_s29, %s102_s2  }
  0x2d   : > { %p657_p1 = scmp.lt.s32.totalorder %s455_s11, 3  ;;  %p658_p2 = scmp.ge.s32.totalorder %s455_s11, 1 }
  0x2f   : > { %p119_p5 = pnand %p658_p2, %p657_p1 }
  0x30   : > { %s581_s24 = sand.u32 (!%p119_p5), 1, %s439_s7  }
  0x31   : > { %122 = sbr.rel (%p119_p5) target bundleno = 121 (0x79), region = 24  ;;  %s272_s25 = sshll.u32 (!%p119_p5), %s581_s24, 3 }
  0x32   : > { %s125_s26 = scalar_lea.sflag (!%p119_p5), [#allocation3], %s581_s24  ;;  %s128_s28 = scalar_lea.vmem (!%p119_p5), [#allocation2], %s272_s25 }
  0x38   : > { %426 = dma.done.wait (%p517_p8), %s125_s26, 128  }
  0x39   : > { %428 = vsyncadd (%p517_p8), %s125_s26, 4294967168  ;;  %s590_s27 = scalar_lea.vmem [#allocation5], %s581_s24  ;;  %v458_v0 = vmov 0.0   ;;  %v152_v1 = vld [vmem:[%s128_s28] sm:$0xff]  ;;  %s273_s18 = sshll.u32 %s447_s9, 4 }
  0x3a   : > { %151 = vst [vmem:[%s590_s27] sm:$0x1] %v458_v0  ;;  %v154_v2 = vand.u32 2147483647, %v152_v1  ;;  %v153_v12 = vmax.f32 %v152_v1, 0.0  ;;  %s190_s29 = sshll.u32 %s590_s27, 4  ;;  %s599_s3 = scalar_lea.hbm %s650_s1, %s273_s18  ;;  %s601_s29 = int_to_ptr.vmem [resolvable:$true] %s190_s29 }
  0x3b   : > { %s178_s4 = scalar_lea.sflag [#allocation4], %s581_s24  ;;  %s373_s5 = scalar_lea.vmem %s601_s29, 16 }
  0x3c   : > { %v155_v3 = vsub.f32 0.0, %v154_v2  ;;  %p374_p8 = scmp.ne.s32.totalorder %s601_s29, %s373_s5  ;;  %p659_p9 = scmp.ne.s32.totalorder %s654_s19, 0 }
  0x3d   : > { %s459_s9 = smov [#allocation5]  }
  0x3e   : > { %v156_v4 = vmul.f32 1.442695, %v155_v3  ;;  %p375_p11 = pnand %p374_p8, %p659_p9  ;;  %s377_s12 = sshll.u32 %s459_s9, 4  ;;  %s378_s12 = int_to_ptr.vmem [resolvable:$false] %s377_s12 }
  0x3f   : > { %s379_s13 = scalar_lea.vmem %s378_s12, 32  ;;  %p380_p7 = scmp.lt.s32.totalorder %s601_s29, %s378_s12 }
  0x40   : > { %339 = vpow2.f32 %v156_v4  ;;  %p376_p0 = pneg %p375_p11  ;;  %p381_p13 = scmp.lt.s32.totalorder %s379_s13, %s373_s5 }
  0x41   : > { %v168_v21 = vld [vmem:[%s590_s27] sm:$0x1] }
  0x42   : > { %p382_p3 = por %p381_p13, %p380_p7 }
  0x44   : > { %p383_p6 = pnand %p382_p3, %p376_p0 }
  0x4a   : > { %v340_v5 = vpop.eup %339 }
  0x4b   : > { %v158_v6 = vadd.f32 1.0, %v340_v5  ;;  %v161_v7 = vmul.f32 -0.5, %v340_v5  ;;  %v164_v9 = vand.u32 2147483647, %v340_v5 }
  0x4d   : > { %341 = vlog2.f32 %v158_v6  ;;  %v162_v8 = vadd.f32 1.0, %v161_v7  ;;  %vm165_vm0 = vcmp.lt.f32.partialorder %v164_v9, 0.0004427343 }
  0x4f   : > { %v163_v10 = vmul.f32 %v340_v5, %v162_v8 }
  0x57   : > { %v342_v11 = vpop.eup %341 }
  0x58   : > { %v160_v13 = vmul.f32 0.6931472, %v342_v11 }
  0x5a   : > { %v166_v14 = vsel %vm165_vm0, %v163_v10, %v160_v13 }
  0x5b   : > { %v167_v15 = vadd.f32 %v166_v14, %v153_v12 }
  0x5d   : > { %v169_v16 = vrot.slane %v167_v15, 4 }
  0x5f   : > { %v170_v17 = vadd.f32 %v169_v16, %v167_v15 }
  0x61   : > { %v171_v18 = vrot.slane %v170_v17, 2 }
  0x63   : > { %v172_v19 = vadd.f32 %v171_v18, %v170_v17 }
  0x65   : > { %v173_v20 = vrot.slane %v172_v19, 1 }
  0x67   : > { %v174_v22 = vadd.f32 %v173_v20, %v172_v19 }
  0x69   : > { %v175_v23 = vadd.f32 %v174_v22, %v168_v21 }
  0x6b   : > { %176 = vst [vmem:[%s590_s27] sm:$0x1] %v175_v23 }
  0x6c   : > { %386 = shalt.err (!%p383_p6)
}
  0x6d   : > { %s387_s15 = scalar_lea.hbm %s599_s3, 16  ;;  %s391_s22 = scalar_lea.hbm %s650_s1, 32 }
  0x6e   : > { %p388_p4 = scmp.ne.s32.totalorder %s599_s3, %s387_s15  ;;  %p392_p1 = scmp.lt.u32.totalorder %s599_s3, %s650_s1 }
  0x6f   : > { %p393_p2 = scmp.lt.u32.totalorder %s391_s22, %s387_s15  ;;  %p395_p8 = scmp.lt.u32.totalorder %s387_s15, %s599_s3 }
  0x70   : > { %p389_p10 = pnand %p388_p4, %p659_p9 }
  0x71   : > { %p394_p5 = por %p393_p2, %p392_p1 }
  0x72   : > { %p390_p12 = pneg %p389_p10 }
  0x73   : > { %p396_p11 = por %p395_p8, %p394_p5 }
  0x75   : > { %p397_p0 = pnand %p396_p11, %p390_p12 }
  0x77   : > { %400 = shalt.err (!%p397_p0)
}
  0x78   : > { %278 = dma.vmem_to_hbm [thread:$0]  (%p659_p9), %s601_s29, 16, %s599_s3, %s178_s4  }
  0x79 PF: > { %s202_s25 = sand.u32 1, %s435_s6   ;;  %p660_p7 = scmp.ne.s32.totalorder %s655_s21, 0 }
  0x7a   : > { %p661_p13 = scmp.ge.s32.totalorder %s455_s11, 2  ;;  %s203_s26 = scalar_lea.sflag [#allocation4], %s202_s25 }
  0x7c   : > { %p285_p3 = pnand %p661_p13, %p660_p7 }
  0x7e   : > { %430 = dma.done.wait (!%p285_p3), %s203_s26, 16  }
  0x7f   : > { %432 = vsyncadd (!%p285_p3), %s203_s26, 4294967280  ;;  %s17_s11 = sadd.s32 1, %s455_s11   ;;  %s662_s6 = smov %s439_s7 }
  0x80   : > { %p14_p6 = scmp.ge.s32.totalorder %s17_s11, 4   ;;  %s663_s7 = smov %s443_s8 }
  0x81   : > { %s664_s8 = smov %s526_s20  ;;  %s665_s9 = smov %s451_s10 }
  0x82   : > { %s666_s10 = smov %s668_s14  ;;  %16 = sbr.rel (!%p14_p6) target bundleno = 6 (0x6), region = 73 }
  0x89   :  { %207 = vsyncpa [#allocation3], 1 }
  0x8a   :  { %209 = vsyncpa [#allocation3 + $0x1], 1 }
  0x8b   :  { %210 = vsyncpa [#allocation4], 1 }
  0x8c   :  { %212 = vsyncpa [#allocation4 + $0x1], 1 }

</bundles_post_ra>
